<compile_context>
chip_gen: v5e
topology: v5e:2x2
jax: 0.10.0
libtpu: 0.0.40
codegen_flags: <defaults>
</compile_context>

<pallas_src>
import jax
import jax.numpy as jnp
from jax.experimental import pallas as pl
from jax.experimental.pallas import tpu as pltpu  # noqa: F401  (TPU backend)

IMG_SIZE = 16   # self.args.img_size (small synthetic size)
LANES = 128


def _make_transmission_kernel(rows):
    """Build the kernel for parameters occupying `rows` sublane rows of 128 lanes."""

    def kernel(params_ref, out_ref):
        p = params_ref[...]                           # (3*rows, 128) — one load
        a1 = p[0 * rows:1 * rows, :]                  # (rows, 128)
        a2 = p[1 * rows:2 * rows, :]
        d2 = p[2 * rows:3 * rows, :]

        # --- utils.dequantize_tensor(utils.quantize_tensor(delta2)) --------
        # 8-bit affine quantization round-trip (min/max over the whole tensor).
        # Fused min & max: single cross-lane reduce over [d2, -d2].
        qmin = jnp.float32(0.0)
        qmax = jnp.float32(255.0)
        both = jnp.concatenate([d2, -d2], axis=0)             # (2*rows, 128)
        row_max = jnp.max(both, axis=-1, keepdims=True)       # (2*rows, 1)
        max_val = jnp.max(row_max[0:rows, :])
        min_val = -jnp.max(row_max[rows:2 * rows, :])
        # Guard against a constant tensor (span == 0 -> inf/NaN).
        span = jnp.maximum(max_val - min_val, jnp.float32(1e-12))
        scale = span / (qmax - qmin)
        inv_scale = (qmax - qmin) / span                       # hoisted reciprocal
        zero_point = jnp.round(jnp.clip(qmin - min_val * inv_scale, qmin, qmax))
        q = jnp.round(jnp.clip(zero_point + d2 * inv_scale, qmin, qmax))
        d2q = scale * (q - zero_point)

        # --- trig (EUP): one cos + one sin on a sublane-dense stack --------
        angles = jnp.concatenate([d2q * 0.5, a1, a1 - a2], axis=0)  # (3*rows, 128)
        c = jnp.cos(angles)                                         # 1 EUP push
        s = jnp.sin(angles)                                         # 1 EUP push
        cos_d2 = c[0 * rows:1 * rows, :]
        cos_a1 = c[1 * rows:2 * rows, :]
        cos_sub = c[2 * rows:3 * rows, :]
        sin_d2 = s[0 * rows:1 * rows, :]
        sin_a1 = s[1 * rows:2 * rows, :]
        sin_sub = s[2 * rows:3 * rows, :]

        # --- 4 unique products; signs / duplication happen in the wrapper --
        p1 = cos_sub * sin_d2     # left_real[0] = -p1, right_real[1] = -p1
        p2 = sin_sub * sin_d2     # left_real[1] = -p2, right_real[0] =  p2
        p3 = cos_a1 * cos_d2      # left_imag[0] = -p3, right_imag[1] =  p3
        p4 = sin_a1 * cos_d2      # left_imag[1] =  p4, right_imag[0] =  p4

        # One full-width unmasked store: (4*rows, 128) = one f32 vreg for rows=2.
        out_ref[...] = jnp.concatenate([p1, p2, p3, p4], axis=0)

    return kernel


def transmission_layer(x, alpha1, alpha2, delta2):
    """Pallas implementation of TransmissionLayer.forward.

    x        : [2, H, W] float32 (only its shape/dtype matter, as in PyTorch)
    alpha1/2 : [H, W] float32
    delta2   : [H, W] float32
    returns  : (left_output, right_output), each complex64 of shape [2, H, W]
    """
    C, H, W = x.shape
    assert C == 2 and alpha1.shape == (H, W)
    P = H * W
    # Lane-dense flattening requires H*W to be a multiple of 128 (true for the
    # module's img_size=16 -> 256).  Other sizes would need padding or a grid.
    assert P % LANES == 0, "H*W must be a multiple of 128 for the lane-dense path"
    rows = P // LANES

    # Single stacked parameter slab: rows [a1; a2; d2], each `rows` x 128.
    params = jnp.concatenate(
        [alpha1.reshape(rows, LANES),
         alpha2.reshape(rows, LANES),
         delta2.reshape(rows, LANES)], axis=0).astype(jnp.float32)

    cost = pl.CostEstimate(
        flops=int(24 * P),               # quant round-trip + products
        transcendentals=int(6 * P),      # cos/sin of 3 angle arrays
        bytes_accessed=int((3 * P + 4 * P) * 4))

    slab = pl.pallas_call(
        _make_transmission_kernel(rows),
        out_shape=jax.ShapeDtypeStruct((4 * rows, LANES), jnp.float32),
        in_specs=[pl.BlockSpec((3 * rows, LANES), lambda: (0, 0))],
        out_specs=pl.BlockSpec((4 * rows, LANES), lambda: (0, 0)),
        cost_estimate=cost,
    )(params)

    # Wrapper-side duplication / sign flips / complex packing (XLA fuses these;
    # Mosaic does not emit complex dtypes).
    prods = slab.reshape(4, H, W)
    p1, p2, p3, p4 = prods[0], prods[1], prods[2], prods[3]
    left_output = jax.lax.complex(jnp.stack([-p1, -p2], axis=0),
                                  jnp.stack([-p3, p4], axis=0))
    right_output = jax.lax.complex(jnp.stack([p2, -p1], axis=0),
                                   jnp.stack([p4, p3], axis=0))
    return left_output, right_output


if __name__ == "__main__":
    key = jax.random.PRNGKey(0)
    k1, k2, k3, kx = jax.random.split(key, 4)

    H = W = IMG_SIZE
    two_pi = 2.0 * jnp.pi
    # Parameters: 2*pi*uniform(0,1), matching the PyTorch __init__.
    alpha1 = two_pi * jax.random.uniform(k1, (H, W), dtype=jnp.float32)
    alpha2 = two_pi * jax.random.uniform(k2, (H, W), dtype=jnp.float32)
    delta2 = two_pi * jax.random.uniform(k3, (H, W), dtype=jnp.float32)

    # Input x: [2, H, W] float32 (values unused by the forward, only shape).
    x = jax.random.normal(kx, (2, H, W), dtype=jnp.float32)

    left_out, right_out = transmission_layer(x, alpha1, alpha2, delta2)
    jax.block_until_ready((left_out, right_out))

    # Reference check in plain JAX (same math, including quant round-trip).
    qmin, qmax = 0.0, 255.0
    mn, mx = jnp.min(delta2), jnp.max(delta2)
    span = jnp.maximum(mx - mn, 1e-12)
    scale = span / (qmax - qmin)
    inv_scale = (qmax - qmin) / span
    zp = jnp.round(jnp.clip(qmin - mn * inv_scale, qmin, qmax))
    d2q = scale * (jnp.round(jnp.clip(zp + delta2 * inv_scale, qmin, qmax)) - zp)
    cd, sd = jnp.cos(d2q / 2), jnp.sin(d2q / 2)
    ca1, sa1 = jnp.cos(alpha1), jnp.sin(alpha1)
    cs, ss = jnp.cos(alpha1 - alpha2), jnp.sin(alpha1 - alpha2)
    left_ref = jax.lax.complex(
        jnp.stack([-cs * sd, -ss * sd]), jnp.stack([-ca1 * cd, sa1 * cd]))
    right_ref = jax.lax.complex(
        jnp.stack([ss * sd, -cs * sd]), jnp.stack([sa1 * cd, ca1 * cd]))

    assert jnp.allclose(left_out, left_ref, atol=1e-5)
    assert jnp.allclose(right_out, right_ref, atol=1e-5)
    print("KERNEL_OK")
</pallas_src>

<mosaic_0001>
module attributes {stable_mosaic.version = 11 : i64} {
  func.func @kernel(%arg0: memref<6x128xf32, #tpu.memory_space<vmem>>, %arg1: memref<8x128xf32, #tpu.memory_space<vmem>>) attributes {dimension_semantics = [], scalar_prefetch = 0 : i64, scratch_operands = 0 : i64, tpu.core_type = #tpu.core_type<tc>} {
    %c0 = arith.constant 0 : index
    %c0_0 = arith.constant 0 : index
    %0 = vector.load %arg0[%c0, %c0_0] : memref<6x128xf32, #tpu.memory_space<vmem>>, vector<6x128xf32>
    %1 = vector.extract_strided_slice %0 {offsets = [0, 0], sizes = [2, 128], strides = [1, 1]} : vector<6x128xf32> to vector<2x128xf32>
    %2 = vector.extract_strided_slice %0 {offsets = [2, 0], sizes = [2, 128], strides = [1, 1]} : vector<6x128xf32> to vector<2x128xf32>
    %3 = vector.extract_strided_slice %0 {offsets = [4, 0], sizes = [2, 128], strides = [1, 1]} : vector<6x128xf32> to vector<2x128xf32>
    %cst = arith.constant 0.000000e+00 : f32
    %4 = vector.broadcast %cst : f32 to vector<2x128xf32>
    %5 = arith.subf %4, %3 : vector<2x128xf32>
    %6 = tpu.concatenate %3, %5 in 0 : vector<2x128xf32>, vector<2x128xf32> -> vector<4x128xf32>
    %cst_1 = arith.constant dense<0xFF800000> : vector<4xf32>
    %7 = vector.multi_reduction <maximumf>, %6, %cst_1 [1] : vector<4x128xf32> to vector<4xf32>
    %8 = vector.shape_cast %7 : vector<4xf32> to vector<4x1xf32>
    %9 = vector.extract_strided_slice %8 {offsets = [0, 0], sizes = [2, 1], strides = [1, 1]} : vector<4x1xf32> to vector<2x1xf32>
    %10 = vector.shape_cast %9 : vector<2x1xf32> to vector<1x2x1xf32>
    %cst_2 = arith.constant dense<0xFF800000> : vector<1xf32>
    %11 = vector.multi_reduction <maximumf>, %10, %cst_2 [1, 2] : vector<1x2x1xf32> to vector<1xf32>
    %12 = vector.shape_cast %11 : vector<1xf32> to vector<1x1x1xf32>
    %13 = vector.extract %12[0, 0, 0] : f32 from vector<1x1x1xf32>
    %14 = vector.extract_strided_slice %8 {offsets = [2, 0], sizes = [2, 1], strides = [1, 1]} : vector<4x1xf32> to vector<2x1xf32>
    %15 = vector.shape_cast %14 : vector<2x1xf32> to vector<1x2x1xf32>
    %cst_3 = arith.constant dense<0xFF800000> : vector<1xf32>
    %16 = vector.multi_reduction <maximumf>, %15, %cst_3 [1, 2] : vector<1x2x1xf32> to vector<1xf32>
    %17 = vector.shape_cast %16 : vector<1xf32> to vector<1x1x1xf32>
    %18 = vector.extract %17[0, 0, 0] : f32 from vector<1x1x1xf32>
    %cst_4 = arith.constant 0.000000e+00 : f32
    %19 = arith.subf %cst_4, %18 : f32
    %20 = arith.subf %13, %19 : f32
    %cst_5 = arith.constant 9.99999996E-13 : f32
    %21 = arith.maximumf %20, %cst_5 : f32
    %cst_6 = arith.constant 2.550000e+02 : f32
    %cst_7 = arith.constant 0.000000e+00 : f32
    %22 = arith.subf %cst_6, %cst_7 : f32
    %23 = arith.divf %21, %22 : f32
    %cst_8 = arith.constant 2.550000e+02 : f32
    %cst_9 = arith.constant 0.000000e+00 : f32
    %24 = arith.subf %cst_8, %cst_9 : f32
    %25 = arith.divf %24, %21 : f32
    %26 = arith.mulf %19, %25 : f32
    %cst_10 = arith.constant 0.000000e+00 : f32
    %27 = arith.subf %cst_10, %26 : f32
    %cst_11 = arith.constant 0.000000e+00 : f32
    %cst_12 = arith.constant 2.550000e+02 : f32
    %28 = arith.maximumf %cst_11, %27 : f32
    %29 = arith.minimumf %cst_12, %28 : f32
    %30 = math.roundeven %29 : f32
    %31 = vector.broadcast %25 : f32 to vector<2x128xf32>
    %32 = arith.mulf %3, %31 : vector<2x128xf32>
    %33 = vector.broadcast %30 : f32 to vector<2x128xf32>
    %34 = arith.addf %33, %32 : vector<2x128xf32>
    %cst_13 = arith.constant 0.000000e+00 : f32
    %cst_14 = arith.constant 2.550000e+02 : f32
    %35 = vector.broadcast %cst_13 : f32 to vector<2x128xf32>
    %36 = arith.maximumf %35, %34 : vector<2x128xf32>
    %37 = vector.broadcast %cst_14 : f32 to vector<2x128xf32>
    %38 = arith.minimumf %37, %36 : vector<2x128xf32>
    %39 = math.roundeven %38 : vector<2x128xf32>
    %40 = vector.broadcast %30 : f32 to vector<2x128xf32>
    %41 = arith.subf %39, %40 : vector<2x128xf32>
    %42 = vector.broadcast %23 : f32 to vector<2x128xf32>
    %43 = arith.mulf %42, %41 : vector<2x128xf32>
    %cst_15 = arith.constant 5.000000e-01 : f32
    %44 = vector.broadcast %cst_15 : f32 to vector<2x128xf32>
    %45 = arith.mulf %43, %44 : vector<2x128xf32>
    %46 = arith.subf %1, %2 : vector<2x128xf32>
    %47 = tpu.concatenate %45, %1, %46 in 0 : vector<2x128xf32>, vector<2x128xf32>, vector<2x128xf32> -> vector<6x128xf32>
    %48 = math.cos %47 : vector<6x128xf32>
    %49 = math.sin %47 : vector<6x128xf32>
    %50 = vector.extract_strided_slice %48 {offsets = [0, 0], sizes = [2, 128], strides = [1, 1]} : vector<6x128xf32> to vector<2x128xf32>
    %51 = vector.extract_strided_slice %48 {offsets = [2, 0], sizes = [2, 128], strides = [1, 1]} : vector<6x128xf32> to vector<2x128xf32>
    %52 = vector.extract_strided_slice %48 {offsets = [4, 0], sizes = [2, 128], strides = [1, 1]} : vector<6x128xf32> to vector<2x128xf32>
    %53 = vector.extract_strided_slice %49 {offsets = [0, 0], sizes = [2, 128], strides = [1, 1]} : vector<6x128xf32> to vector<2x128xf32>
    %54 = vector.extract_strided_slice %49 {offsets = [2, 0], sizes = [2, 128], strides = [1, 1]} : vector<6x128xf32> to vector<2x128xf32>
    %55 = vector.extract_strided_slice %49 {offsets = [4, 0], sizes = [2, 128], strides = [1, 1]} : vector<6x128xf32> to vector<2x128xf32>
    %56 = arith.mulf %52, %53 : vector<2x128xf32>
    %57 = arith.mulf %55, %53 : vector<2x128xf32>
    %58 = arith.mulf %51, %50 : vector<2x128xf32>
    %59 = arith.mulf %54, %50 : vector<2x128xf32>
    %60 = tpu.concatenate %56, %57, %58, %59 in 0 : vector<2x128xf32>, vector<2x128xf32>, vector<2x128xf32>, vector<2x128xf32> -> vector<8x128xf32>
    %c0_16 = arith.constant 0 : index
    %c0_17 = arith.constant 0 : index
    %61 = vector.load %arg1[%c0_16, %c0_17] : memref<8x128xf32, #tpu.memory_space<vmem>>, vector<8x128xf32>
    tpu.vector_store %arg1[%c0_16, %c0_17], %60 {strides = array<i32>} : memref<8x128xf32, #tpu.memory_space<vmem>>, vector<8x128xf32>,
    return
  }
}

</mosaic_0001>

<bundles_post_ra>
// kernel: tpu_custom_call.1
= control target key start
LH: loop header
LB: loop body
LE: loop exit
PB: predicated region body
PF: predicated region fallthrough
CT: control target
= control target key end

     0   :  { %6 = vsyncpa [#allocation3], 0  ;;  %s670_s0 = inlined_call_operand.hbm [shape: f32[6,128], index: 0, kind: input, shape index: {}]   ;;  %s671_s1 = inlined_call_operand.hbm [shape: f32[8,128], index: 1, kind: output, shape index: {}]  }
   0x1   :  { %7 = vsyncpa [#allocation4], 0  ;;  %s13_s8 = sshll.u32 %s670_s0, 4  ;;  %s563_s9 = smov [#allocation2]   ;;  %s14_s8 = int_to_ptr.hbm [resolvable:$true] %s13_s8 }
   0x2   :  { %s15_s10 = sshll.u32 %s563_s9, 4  ;;  %s16_s10 = int_to_ptr.vmem [resolvable:$true] %s15_s10 }
   0x3   :  { %18 = dma.hbm_to_vmem [thread:$0]  %s14_s8, 128, %s16_s10, [#allocation3]  }
   0x4   :  { %559 = dma.done.wait [#allocation3], 128  }
   0x5   :  { %560 = vsyncadd [#allocation3], 4294967168  ;;  %v589_v0 = vld [vmem:[#allocation2] sm:$0x3f]  ;;  %vm31_vm0 = vcmask 1041408   ;;  %vm33_vm1 = vcmask 1043456  }
   0x6   :  { %v24_v1 = vsub.f32 0.0, %v589_v0  ;;  %v26_v2 = vrot.slane %v589_v0, 4  ;;  %v564_v6 = vmov 255.0   ;;  %vm45_vm2 = vcmask 1043458   ;;  %s565_s14 = smov 1e-12  }
   0x7   :  { %507 = vrcp.f32 %v564_v6  ;;  %s566_s21 = smov 0.0   ;;  %s567_s23 = smov 255.0   ;;  %v106_v50 = vrot.slane %v589_v0, 2  ;;  %v112_v58 = vrot.slane %v589_v0, 6 }
   0x8   :  { %v29_v3 = vrot.slane %v24_v1, 2  ;;  %s575_s3 = smov [#allocation5]   ;;  %s462_s7 = sshll.u32 %s671_s1, 4  ;;  %s463_s7 = int_to_ptr.hbm [resolvable:$true] %s462_s7 }
   0x9   :  { %v108_v55 = vsub.f32 %v589_v0, %v106_v50  ;;  %s460_s4 = sshll.u32 %s575_s3, 4  ;;  %s461_s4 = int_to_ptr.vmem [resolvable:$true] %s460_s4 }
   0xa   :  { %v32_v4 = vsel %vm31_vm0, %v26_v2, %v29_v3 }
   0xb   :  { %v34_v5 = vsel %vm33_vm1, %v32_v4, -inf  ;;  %v115_v59 = vrot.slane %v108_v55, 4 }
   0xc   :  { %35 = vmax.xlane.f32.xlu0 %v34_v5 }
   0xd   :  { %v508_v7 = vpop.eup %507 }
   0xe   :  { %v58_v8 = vmul.f32 255.0, %v508_v7  ;;  %vm62_vm3 = vweird.f32 %v508_v7 }
  0x10   :  { %v59_v12 = vsub.f32 1.0, %v58_v8 }
  0x12   :  { %v60_v17 = vmul.f32 %v508_v7, %v59_v12  ;;  %v569_v12 = vmov 2475754826  }
  0x14   :  { %v61_v22 = vadd.f32 %v508_v7, %v60_v17 }
  0x16   :  { %v63_v27 = vsel %vm62_vm3, %v508_v7, %v61_v22 }
  0x7f   :  { %v36_v9 = vpop.xlane.xlu0 %35 }
  0x80   :  { %v37_v10 = vsel %vm31_vm0, %v36_v9, -inf  ;;  %v46_v11 = vsel %vm45_vm2, %v36_v9, -inf }
  0x81   :  { %v38_v13 = vrot.slane %v37_v10, 4  ;;  %v47_v14 = vrot.slane %v46_v11, 4 }
  0x83   :  { %v39_v15 = vmax.f32 %v37_v10, %v38_v13  ;;  %v48_v16 = vmax.f32 %v46_v11, %v47_v14  ;;  %v568_v10 = vmov 683565275  }
  0x85   :  { %v40_v18 = vrot.slane %v39_v15, 2  ;;  %v49_v19 = vrot.slane %v48_v16, 2 }
  0x87   :  { %v41_v20 = vmax.f32 %v39_v15, %v40_v18  ;;  %v50_v21 = vmax.f32 %v48_v16, %v49_v19  ;;  %v570_v15 = vmov 2131351028   ;;  %v571_v18 = vmov 2102212464  }
  0x89   :  { %v42_v23 = vrot.slane %v41_v20, 1  ;;  %v51_v24 = vrot.slane %v50_v21, 1 }
  0x8b   :  { %v43_v25 = vmax.f32 %v41_v20, %v42_v23  ;;  %v52_v26 = vmax.f32 %v50_v21, %v51_v24  ;;  %v572_v21 = vmov 920167782   ;;  %v573_v24 = vmov 1326507024  }
  0x8d   :  { %478 = vpush %v43_v25 }
  0x8e   :  { %480 = vpush %v52_v26 }
  0x8f   :  { %482 = vpush %v63_v27 }
  0xbe   :  { %s479_s0 = spop %478 }
  0xbf   :  { %s481_s11 = spop %480 }
  0xc0   :  { %s54_s12 = ssub.f32 0.0, %s481_s11  ;;  %s599_s16 = spop %482 }
  0xc2   :  { %s55_s13 = ssub.f32 %s479_s0, %s54_s12 }
  0xc4   :  { %s596_s15 = smax.f32 %s565_s14, %s55_s13 }
  0xc5   :  { %v66_v28 = vstv %s596_s15  ;;  %s65_s2 = smul.f32 %s599_s16, %s596_s15 }
  0xc6   :  { %509 = vrcp.f32 %v66_v28  ;;  %v78_v32 = vand.u32 2147483648, %v66_v28  ;;  %v76_v34 = vand.u32 2147483647, %v66_v28  ;;  %vm72_vm5 = vweird.f32 %v66_v28 }
  0xc7   :  { %v103_v54 = vstv %s65_s2 }
  0xc8   :  { %v79_v36 = vor.u32 1.1754944e-38, %v78_v32  ;;  %vm77_vm7 = vcmp.eq.f32.partialorder %v76_v34, 8.507059e+37 }
  0xcc   :  { %v510_v29 = vpop.eup %509 }
  0xcd   :  { %v68_v30 = vmul.f32 %v510_v29, %v66_v28  ;;  %vm73_vm4 = vweird.f32 %v510_v29 }
  0xce   :  { %vm74_vm6 = vmor %vm72_vm5, %vm73_vm4 }
  0xcf   :  { %v69_v31 = vsub.f32 1.0, %v68_v30 }
  0xd1   :  { %v70_v33 = vmul.f32 %v510_v29, %v69_v31 }
  0xd3   :  { %v71_v35 = vadd.f32 %v510_v29, %v70_v33 }
  0xd5   :  { %v75_v37 = vsel %vm74_vm6, %v510_v29, %v71_v35 }
  0xd6   :  { %v80_v38 = vsel %vm77_vm7, %v79_v36, %v75_v37 }
  0xd7   :  { %484 = vpush %v80_v38 }
 0x108   :  { %s485_s17 = spop %484 }
 0x109   :  { %s82_s18 = smul.f32 255.0, %s485_s17 }
 0x10b   :  { %s83_s19 = smul.f32 %s82_s18, %s54_s12  ;;  %v95_v39 = vstv %s82_s18 }
 0x10c   :  { %v96_v40 = vmul.f32 %v95_v39, %v589_v0 }
 0x10d   :  { %s84_s20 = ssub.f32 0.0, %s83_s19 }
 0x10f   :  { %s85_s22 = smax.f32 %s566_s21, %s84_s20 }
 0x110   :  { %s86_s24 = smin.f32 %s567_s23, %s85_s22 }
 0x111   :  { %s87_s25 = scvt.f32.s32 %s86_s24  ;;  %s92_s26 = sand.u32 2147483647, %s86_s24 }
 0x112   :  { %s90_s28 = sand.u32 2147483648, %s86_s24  ;;  %p93_p0 = scmp.lt.f32.partialorder %s92_s26, 2.1474836e+09 }
 0x113   :  { %s88_s27 = scvt.s32.f32 %s87_s25 }
 0x115   :  { %s89_s29 = sand.u32 2147483647, %s88_s27 }
 0x116   :  { %s91_s30 = sor.u32 %s90_s28, %s89_s29 }
 0x117   :  { %s673_s30 = smov (!%p93_p0, %s91_s30), %s86_s24 }
 0x118   :  { %v97_v41 = vstv %s673_s30 }
 0x119   :  { %v98_v42 = vadd.f32 %v97_v41, %v96_v40 }
 0x11b   :  { %v99_v43 = vmax.f32 %v98_v42, 0.0 }
 0x11d   :  { %v100_v44 = vmin.f32 %v99_v43, 255.0 }
 0x11f   :  { %v488_v45 = vcvt.f32.s32 %v100_v44  ;;  %v486_v47 = vand.u32 2147483647, %v100_v44  ;;  %v491_v49 = vand.u32 2147483648, %v100_v44 }
 0x121   :  { %v489_v46 = vcvt.s32.f32 %v488_v45  ;;  %vm487_vm8 = vcmp.lt.f32.partialorder %v486_v47, 8388608.0 }
 0x123   :  { %v490_v48 = vand.u32 2147483647, %v489_v46 }
 0x125   :  { %v492_v51 = vor.u32 %v491_v49, %v490_v48 }
 0x127   :  { %v493_v52 = vsel %vm487_vm8, %v492_v51, %v100_v44 }
 0x128   :  { %v102_v53 = vsub.f32 %v493_v52, %v97_v41 }
 0x12a   :  { %v104_v56 = vmul.f32 %v103_v54, %v102_v53 }
 0x12c   :  { %v105_v57 = vmul.f32 0.5, %v104_v56 }
 0x12e   :  { %v110_v60 = vrot.slane %v105_v57, 4 }
 0x130   :  { %v117_v61 = vsel %vm31_vm0, %v110_v60, %v112_v58 }
 0x131   :  { %v609_v62 = vsel %vm33_vm1, %v117_v61, %v115_v59  ;;  %v574_v61 = vmov 0  }
 0x132   :  { %v122_v63 = vand.u32 2139095040, %v609_v62  ;;  %v119_v3 = vand.u32 2147483647, %v609_v62  ;;  %vm121_vm7 = vcmp.lt.s32.totalorder %v609_v62, 0 }
 0x134   :  { %v123_v1 = vshrl.u32 %v122_v63, 23  ;;  %v126_v5 = vand.u32 8388607, %v119_v3  ;;  %vm120_vm8 = vcmp.le.f32.partialorder %v119_v3, 0.7853982 }
 0x136   :  { %v472_v2 = vadd.s32 4294967169, %v123_v1  ;;  %v127_v8 = vor.u32 8388608, %v126_v5 }
 0x138   :  { %v129_v4 = vadd.s32 1, %v472_v2  ;;  %v626_v31 = vshll.u32 %v127_v8, 8 }
 0x13a   :  { %vm130_vm9 = vcmp.gt.s32.totalorder %v129_v4, 0  ;;  %v168_v40 = vand.u32 65535, %v626_v31  ;;  %v169_v45 = vshrl.u32 %v626_v31, 16 }
 0x13b   :  { %v131_v6 = vsel %vm130_vm9, %v129_v4, 0 }
 0x13c   :  { %v133_v0 = vand.u32 31, %v131_v6  ;;  %v617_v9 = vshrl.u32 %v131_v6, 5 }
 0x13e   :  { %v615_v7 = vsub.s32 32, %v133_v0  ;;  %v136_v11 = vshll.u32 %v568_v10, %v133_v0  ;;  %v139_v13 = vshll.u32 %v569_v12, %v133_v0  ;;  %v142_v17 = vshll.u32 %v570_v15, %v133_v0 }
 0x13f   :  { %v145_v20 = vshll.u32 %v571_v18, %v133_v0  ;;  %v148_v23 = vshll.u32 %v572_v21, %v133_v0  ;;  %vm151_vm10 = vcmp.lt.s32.totalorder %v617_v9, 1  ;;  %vm154_vm11 = vcmp.lt.s32.totalorder %v617_v9, 4 }
 0x140   :  { %v137_v14 = vshrl.u32 %v569_v12, %v615_v7  ;;  %v140_v16 = vshrl.u32 %v570_v15, %v615_v7  ;;  %v143_v19 = vshrl.u32 %v571_v18, %v615_v7  ;;  %v146_v22 = vshrl.u32 %v572_v21, %v615_v7 }
 0x141   :  { %v149_v25 = vshrl.u32 %v573_v24, %v615_v7  ;;  %vm153_vm12 = vcmp.lt.s32.totalorder %v617_v9, 3  ;;  %vm152_vm13 = vcmp.lt.s32.totalorder %v617_v9, 2  ;;  %v135_v5 = vshrl.u32 %v568_v10, %v615_v7 }
 0x142   :  { %v138_v26 = vor.u32 %v137_v14, %v136_v11  ;;  %v141_v27 = vor.u32 %v140_v16, %v139_v13  ;;  %v144_v28 = vor.u32 %v143_v19, %v142_v17  ;;  %v147_v29 = vor.u32 %v146_v22, %v145_v20 }
 0x143   :  { %v150_v30 = vor.u32 %v149_v25, %v148_v23 }
 0x144   :  { %v159_v32 = vsel %vm151_vm10, %v138_v26, %v141_v27  ;;  %v163_v33 = vsel %vm151_vm10, %v141_v27, %v144_v28  ;;  %v160_v34 = vsel %vm154_vm11, %v147_v29, 920167782  ;;  %v156_v60 = vsel %vm154_vm11, %v144_v28, 2102212464 }
 0x145   :  { %v164_v35 = vsel %vm154_vm11, %v150_v30, 1326507024  ;;  %v161_v36 = vsel %vm153_vm12, %v144_v28, %v160_v34  ;;  %v155_v14 = vsel %vm151_vm10, %v135_v5, %v138_v26  ;;  %v157_v15 = vsel %vm153_vm12, %v141_v27, %v156_v60 }
 0x146   :  { %v165_v37 = vsel %vm153_vm12, %v147_v29, %v164_v35  ;;  %v162_v38 = vsel %vm152_vm13, %v159_v32, %v161_v36  ;;  %v158_v20 = vsel %vm152_vm13, %v155_v14, %v157_v15 }
 0x147   :  { %v166_v39 = vsel %vm152_vm13, %v163_v33, %v165_v37  ;;  %v192_v43 = vand.u32 65535, %v162_v38  ;;  %v193_v44 = vshrl.u32 %v162_v38, 16  ;;  %v212_v23 = vmul.u32 %v626_v31, %v158_v20 }
 0x148   :  { %v170_v41 = vand.u32 65535, %v166_v39  ;;  %v171_v42 = vshrl.u32 %v166_v39, 16 }
 0x149   :  { %v195_v47 = vmul.u32 %v193_v44, %v168_v40  ;;  %v196_v49 = vmul.u32 %v192_v43, %v169_v45  ;;  %v194_v52 = vmul.u32 %v192_v43, %v168_v40  ;;  %v197_v55 = vmul.u32 %v193_v44, %v169_v45 }
 0x14a   :  { %v173_v46 = vmul.u32 %v171_v42, %v168_v40  ;;  %v174_v48 = vmul.u32 %v170_v41, %v169_v45  ;;  %v172_v50 = vmul.u32 %v170_v41, %v168_v40  ;;  %v175_v54 = vmul.u32 %v171_v42, %v169_v45 }
 0x14b   :  { %v198_v53 = vshll.u32 %v195_v47, 16  ;;  %v200_v57 = vshll.u32 %v196_v49, 16  ;;  %v199_v12 = vshrl.u32 %v195_v47, 16  ;;  %v201_v18 = vshrl.u32 %v196_v49, 16 }
 0x14c   :  { %v176_v51 = vshll.u32 %v173_v46, 16  ;;  %v178_v56 = vshll.u32 %v174_v48, 16  ;;  %v177_v8 = vshrl.u32 %v173_v46, 16  ;;  %v179_v16 = vshrl.u32 %v174_v48, 16 }
 0x14d   :  { %vm202_vm15 = vc.u32 %v194_v52, %v198_v53  ;;  %v204_v59 = vadd.s32 %v198_v53, %v194_v52 }
 0x14e   :  { %vm180_vm14 = vc.u32 %v172_v50, %v176_v51  ;;  %v182_v58 = vadd.s32 %v176_v51, %v172_v50  ;;  %v203_v1 = vsel %vm202_vm15, 1, %v574_v61  ;;  %vm262_vm15 = vweird.f32 %v609_v62 }
 0x14f   :  { %v181_v63 = vsel %vm180_vm14, 1, %v574_v61  ;;  %v205_v4 = vadd.s32 %v203_v1, %v197_v55  ;;  %vm206_vm3 = vc.u32 %v204_v59, %v200_v57  ;;  %v208_v10 = vadd.s32 %v204_v59, %v200_v57 }
 0x150   :  { %v183_v2 = vadd.s32 %v181_v63, %v175_v54  ;;  %vm184_vm2 = vc.u32 %v182_v58, %v178_v56  ;;  %v207_v0 = vsel %vm206_vm3, 1, %v574_v61 }
 0x151   :  { %v185_v6 = vsel %vm184_vm2, 1, %v574_v61  ;;  %v209_v13 = vadd.s32 %v207_v0, %v205_v4  ;;  %vm452_vm2 = vcmask 1045504  }
 0x152   :  { %v187_v11 = vadd.s32 %v185_v6, %v183_v2 }
 0x153   :  { %v210_v19 = vadd.s32 %v209_v13, %v199_v12 }
 0x154   :  { %v188_v17 = vadd.s32 %v187_v11, %v177_v8 }
 0x155   :  { %v211_v21 = vadd.s32 %v210_v19, %v201_v18 }
 0x156   :  { %v189_v7 = vadd.s32 %v188_v17, %v179_v16 }
 0x157   :  { %v215_v22 = vadd.s32 1, %v211_v21 }
 0x158   :  { %vm214_vm4 = vc.u32 %v189_v7, %v208_v10  ;;  %v213_v35 = vadd.s32 %v208_v10, %v189_v7 }
 0x159   :  { %v216_v24 = vsel %vm214_vm4, %v215_v22, %v211_v21 }
 0x15a   :  { %v217_v25 = vadd.s32 %v216_v24, %v212_v23 }
 0x15c   :  { %v218_v26 = vadd.s32 536870912, %v217_v25 }
 0x15e   :  { %v219_v28 = vshrl.u32 %v218_v26, 30 }
 0x160   :  { %v220_v29 = vshll.u32 %v219_v28, 30  ;;  %v243_v48 = vsub.s32 4, %v219_v28 }
 0x162   :  { %v221_v27 = vsub.s32 %v217_v25, %v220_v29  ;;  %v244_v53 = vsel %vm121_vm7, %v243_v48, %v219_v28 }
 0x163   :  { %v246_v56 = vsel %vm120_vm8, 0, %v244_v53 }
 0x164   :  { %vm222_vm5 = vcmp.lt.s32.totalorder %v221_v27, 0  ;;  %v223_v30 = vsub.s32 0, %v221_v27  ;;  %v417_v61 = vadd.s32 3, %v246_v56  ;;  %v263_v4 = vand.u32 3, %v246_v56 }
 0x166   :  { %v224_v32 = vsel %vm222_vm5, %v223_v30, %v221_v27  ;;  %v418_v5 = vand.u32 3, %v417_v61  ;;  %vm264_vm9 = vcmp.lt.s32.totalorder %v263_v4, 2  ;;  %vm265_vm10 = vcmp.eq.s32.totalorder %v263_v4, 0 }
 0x167   :  { %v225_v33 = vclz %v224_v32  ;;  %vm268_vm11 = vcmp.eq.s32.totalorder %v263_v4, 2 }
 0x168   :  { %vm419_vm12 = vcmp.lt.s32.totalorder %v418_v5, 2  ;;  %vm420_vm13 = vcmp.eq.s32.totalorder %v418_v5, 0  ;;  %vm423_vm14 = vcmp.eq.s32.totalorder %v418_v5, 2 }
 0x169   :  { %v473_v34 = vadd.s32 4294967294, %v225_v33 }
 0x16b   :  { %vm474_vm6 = vcmp.lt.s32.totalorder %v473_v34, 0 }
 0x16c   :  { %v228_v9 = vsel %vm474_vm6, 0, %v473_v34 }
 0x16d   :  { %v229_v36 = vsub.s32 32, %v228_v9  ;;  %v233_v37 = vsub.s32 4294967266, %v228_v9  ;;  %v230_v38 = vshll.u32 %v221_v27, %v228_v9 }
 0x16f   :  { %v231_v39 = vshrl.u32 %v213_v35, %v229_v36  ;;  %v234_v40 = vadd.s32 127, %v233_v37 }
 0x171   :  { %v232_v31 = vor.u32 %v231_v39, %v230_v38  ;;  %v235_v41 = vshll.u32 %v234_v40, 23 }
 0x173   :  { %v236_v42 = vor.u32 4788187, %v235_v41  ;;  %v239_v44 = vcvt.s32.f32 %v232_v31 }
 0x175   :  { %v237_v43 = vand.u32 2147483647, %v236_v42 }
 0x177   :  { %v240_v45 = vmul.f32 %v239_v44, %v237_v43 }
 0x179   :  { %v241_v46 = vxor.u32 2147483648, %v240_v45 }
 0x17b   :  { %v242_v47 = vsel %vm121_vm7, %v241_v46, %v240_v45 }
 0x17c   :  { %v245_v49 = vsel %vm120_vm8, %v609_v62, %v242_v47 }
 0x17d   :  { %v247_v50 = vmul.f32 %v245_v49, %v245_v49 }
 0x17f   :  { %v248_v51 = vmul.f32 -0.001358992, %v247_v50  ;;  %v255_v52 = vmul.f32 -0.00019511016, %v247_v50 }
 0x181   :  { %v249_v54 = vadd.f32 0.041655596, %v248_v51  ;;  %v256_v55 = vadd.f32 0.008332121, %v255_v52 }
 0x183   :  { %v250_v57 = vmul.f32 %v249_v54, %v247_v50  ;;  %v257_v58 = vmul.f32 %v256_v55, %v247_v50 }
 0x185   :  { %v251_v59 = vadd.f32 -0.4999988, %v250_v57  ;;  %v258_v60 = vadd.f32 -0.16666654, %v257_v58 }
 0x187   :  { %v252_v63 = vmul.f32 %v251_v59, %v247_v50  ;;  %v259_v1 = vmul.f32 %v258_v60, %v247_v50 }
 0x189   :  { %v253_v2 = vadd.f32 1.0, %v252_v63  ;;  %v260_v3 = vadd.f32 1.0, %v259_v1 }
 0x18b   :  { %v261_v6 = vmul.f32 %v260_v3, %v245_v49  ;;  %v269_v0 = vxor.u32 2147483648, %v253_v2 }
 0x18d   :  { %v266_v8 = vxor.u32 2147483648, %v261_v6  ;;  %v270_v12 = vsel %vm268_vm11, %v269_v0, %v261_v6  ;;  %v425_v14 = vsel %vm423_vm14, %v269_v0, %v261_v6 }
 0x18f   :  { %v267_v11 = vsel %vm265_vm10, %v253_v2, %v266_v8  ;;  %v422_v13 = vsel %vm420_vm13, %v253_v2, %v266_v8 }
 0x190   :  { %v271_v15 = vsel %vm264_vm9, %v267_v11, %v270_v12  ;;  %v426_v16 = vsel %vm419_vm12, %v422_v13, %v425_v14 }
 0x191   :  { %v272_v17 = vsel %vm262_vm15, nan, %v271_v15  ;;  %v427_v18 = vsel %vm262_vm15, nan, %v426_v16 }
 0x192   :  { %v429_v19 = vrot.slane %v427_v18, 4  ;;  %v434_v20 = vrot.slane %v272_v17, 6 }
 0x194   :  { %v431_v7 = vmul.f32 %v429_v19, %v272_v17  ;;  %v432_v10 = vmul.f32 %v429_v19, %v427_v18  ;;  %v436_v21 = vmul.f32 %v434_v20, %v272_v17  ;;  %v437_v22 = vmul.f32 %v434_v20, %v427_v18 }
 0x196   :  { %v439_v23 = vrot.slane %v431_v7, 4  ;;  %v442_v24 = vrot.slane %v432_v10, 2  ;;  %v445_v25 = vrot.slane %v436_v21, 6  ;;  %v448_v62 = vrot.slane %v437_v22, 4 }
 0x198   :  { %v450_v26 = vsel %vm31_vm0, %v439_v23, %v442_v24 }
 0x199   :  { %v451_v28 = vsel %vm33_vm1, %v450_v26, %v445_v25 }
 0x19a   :  { %v453_v29 = vsel %vm452_vm2, %v451_v28, %v448_v62 }
 0x19b   :  { %454 = vst [vmem:[#allocation5] sm:$0xff] %v453_v29 }
 0x19c   :  { %465 = dma.vmem_to_hbm [thread:$0]  %s461_s4, 128, %s463_s7, [#allocation4]  }
 0x19d   :  { %561 = dma.done.wait [#allocation4], 128  }
 0x19e   :  { %562 = vsyncadd [#allocation4], 4294967168 }
 0x19f   :  { %470 = vsyncpa [#allocation3], 1 }
 0x1a0   :  { %471 = vsyncpa [#allocation4], 1 }

</bundles_post_ra>
